<compile_context>
chip_gen: v6e
topology: v6e:2x2x1
jax: 0.10.0
libtpu: 0.0.40
codegen_flags: <defaults>
</compile_context>

<pallas_src>
import math

import jax
import jax.numpy as jnp
from jax.experimental import pallas as pl
from jax.experimental.pallas import tpu as pltpu

_N_CLASSES = 1000
_WIDE_FACTOR = 16                        # 16 * 1000 = 16000 = 125 * 128 (lane-aligned)
_WIDE_WIDTH = _WIDE_FACTOR * _N_CLASSES  # 16000
_WIDE_ROW_TILE = 64                      # 64 wide rows == 1024 original rows == 4 MiB f32/block


def _copy_kernel(x_ref, o_ref):
    # Pure lane-dense passthrough: the reshape already happened (for free) in
    # the wrapper, so the kernel body is DMA-in / DMA-out with no relayout.
    o_ref[...] = x_ref[...]


def _pallas_copy_2d(x2d):
    """Identity copy of a 2-D slab through VMEM, tiled over rows if large."""
    m, n = x2d.shape
    out_shape = jax.ShapeDtypeStruct((m, n), x2d.dtype)

    if m <= _WIDE_ROW_TILE:
        # Small slab: single whole-array block resident in VMEM, one grid step.
        return pl.pallas_call(
            _copy_kernel,
            out_shape=out_shape,
            in_specs=[pl.BlockSpec(memory_space=pltpu.MemorySpace.VMEM)],
            out_specs=pl.BlockSpec(memory_space=pltpu.MemorySpace.VMEM),
        )(x2d)

    # Large slab: tile over rows. 64x16000 f32 = 4 MiB per block; with
    # double-buffered input + output that is 16 MiB of VMEM -- comfortably
    # inside v7x's 64 MiB physical VMEM and the 48 MiB limit set below.
    grid = (pl.cdiv(m, _WIDE_ROW_TILE),)
    return pl.pallas_call(
        _copy_kernel,
        out_shape=out_shape,
        grid=grid,
        in_specs=[pl.BlockSpec((_WIDE_ROW_TILE, n), lambda i: (i, 0))],
        out_specs=pl.BlockSpec((_WIDE_ROW_TILE, n), lambda i: (i, 0)),
        compiler_params=pltpu.CompilerParams(
            dimension_semantics=("parallel",),   # shards across v7x's 2 TCs
            vmem_limit_bytes=48 << 20,           # above every default scoped limit, < v7x physical
        ),
    )(x2d)


def reshape_to_1000(x, force_pallas=True):
    """Pallas equivalent of `x.reshape(-1, 1000)` (torch row-major semantics).

    With force_pallas=False this is the recommended production path: the
    reshape is metadata-only and costs zero HBM traffic.  With
    force_pallas=True the result is additionally round-tripped through a
    lane-dense Pallas identity-copy kernel.
    """
    total = math.prod(x.shape)
    assert total % _N_CLASSES == 0, "element count must be divisible by 1000"

    # Metadata-only reshape (free): row-major, matches torch semantics.
    x2d = jnp.reshape(x, (-1, _N_CLASSES))
    if not force_pallas:
        return x2d  # zero-cost path (review optimization #1)

    m = x2d.shape[0]
    if m % _WIDE_FACTOR == 0:
        # Lane-dense wide-row view: width 16000 is an exact multiple of 128,
        # so no lane padding and no masked partial stores.  Both reshapes
        # around the kernel are metadata-only.
        wide = jnp.reshape(x2d, (m // _WIDE_FACTOR, _WIDE_WIDTH))
        out_wide = _pallas_copy_2d(wide)
        return jnp.reshape(out_wide, (m, _N_CLASSES))

    # Fallback: rows not a multiple of 16 -- copy the (m, 1000) view directly.
    return _pallas_copy_2d(x2d)


if __name__ == "__main__":
    key = jax.random.PRNGKey(0)

    # Darknet classifier output just before Reshape: (B, 1000, 1, 1) in NCHW.
    # Case 1: tiny batch -> whole-array single-block kernel (width 1000).
    B1 = 2
    x1 = jax.random.normal(key, (B1, _N_CLASSES, 1, 1), dtype=jnp.float32)
    ref1 = jax.block_until_ready(jnp.reshape(x1, (-1, _N_CLASSES)))

    out1 = jax.block_until_ready(reshape_to_1000(x1))
    assert out1.shape == (B1, _N_CLASSES), out1.shape
    assert out1.dtype == x1.dtype
    assert jnp.array_equal(out1, ref1), "mismatch vs reference reshape (small)"

    # Case 2: batch multiple of 16 -> lane-dense wide-row (M//16, 16000) kernel.
    B2 = 32
    x2 = jax.random.normal(jax.random.PRNGKey(1), (B2, _N_CLASSES, 1, 1),
                           dtype=jnp.float32)
    ref2 = jax.block_until_ready(jnp.reshape(x2, (-1, _N_CLASSES)))

    out2 = jax.block_until_ready(reshape_to_1000(x2))
    assert out2.shape == (B2, _N_CLASSES), out2.shape
    assert jnp.array_equal(out2, ref2), "mismatch vs reference reshape (wide)"

    # Case 3: zero-cost metadata-only path (recommended production path).
    out3 = jax.block_until_ready(reshape_to_1000(x2, force_pallas=False))
    assert jnp.array_equal(out3, ref2), "mismatch vs reference reshape (elided)"

    print("KERNEL_OK")
</pallas_src>

<mosaic_0001>
module attributes {stable_mosaic.version = 11 : i64} {
  func.func @_copy_kernel(%arg0: memref<2x1000xf32, #tpu.memory_space<vmem>>, %arg1: memref<2x1000xf32, #tpu.memory_space<vmem>>) attributes {dimension_semantics = [], scalar_prefetch = 0 : i64, scratch_operands = 0 : i64, tpu.core_type = #tpu.core_type<tc>} {
    %c0 = arith.constant 0 : index
    %c0_0 = arith.constant 0 : index
    %0 = vector.load %arg0[%c0, %c0_0] : memref<2x1000xf32, #tpu.memory_space<vmem>>, vector<2x1000xf32>
    %c0_1 = arith.constant 0 : index
    %c0_2 = arith.constant 0 : index
    %1 = vector.load %arg1[%c0_1, %c0_2] : memref<2x1000xf32, #tpu.memory_space<vmem>>, vector<2x1000xf32>
    tpu.vector_store %arg1[%c0_1, %c0_2], %0 {strides = array<i32>} : memref<2x1000xf32, #tpu.memory_space<vmem>>, vector<2x1000xf32>,
    return
  }
}

</mosaic_0001>

<bundles_post_ra>
// kernel: tpu_custom_call.1
= control target key start
LH: loop header
LB: loop body
LE: loop exit
PB: predicated region body
PF: predicated region fallthrough
CT: control target
= control target key end

     0   :  { %6 = vsyncpa [#allocation3], 0  ;;  %s111_s0 = inlined_call_operand.hbm [shape: f32[2,1000], index: 0, kind: input, shape index: {}]   ;;  %s112_s1 = inlined_call_operand.hbm [shape: f32[2,1000], index: 1, kind: output, shape index: {}]  }
   0x1   :  { %7 = vsyncpa [#allocation4], 0  ;;  %s93_s6 = smov [#allocation2]  }
   0x2   :  { %s14_s7 = sshll.u32 %s93_s6, 4  ;;  %s15_s7 = int_to_ptr.vmem [resolvable:$true] %s14_s7 }
   0x3   :  { %s57_s8 = scalar_lea.vmem %s15_s7, 256  ;;  %p62_p1 = scmp.lt.s32.totalorder %s15_s7, %s15_s7 }
   0x4   :  { %p58_p0 = scmp.ne.s32.totalorder %s15_s7, %s57_s8  ;;  %p63_p2 = scmp.lt.s32.totalorder %s57_s8, %s57_s8 }
   0x6   :  { %p64_p3 = por %p63_p2, %p62_p1 }
   0x8   :  { %p65_p4 = pnand %p64_p3, %p58_p0 }
   0xa   :  { %68 = shalt.err (!%p65_p4)
}
   0xb   :  { %17 = dma.hbm_to_vmem [thread:$0]  %s111_s0, 256, %s15_s7, [#allocation3]  }
   0xc   :  { %89 = dma.done.wait [#allocation3], 256  }
   0xd   :  { %90 = vsyncadd [#allocation3], 4294967040  ;;  %vm24_vm0 = vcmask 1041408   ;;  %vm25_vm1 = vcmask 1043458   ;;  %vm27_vm2 = vcmask 1045508   ;;  %vm29_vm5 = vcmask 850950  }
   0xe   :  { %vm26_vm3 = vmor %vm25_vm1, %vm24_vm0  ;;  %s94_s11 = smov [#allocation5]   ;;  %v21_v0 = vld [vmem:[#allocation2] sm:$0xff]  ;;  %v22_v1 = vld [vmem:[#allocation2 + $0x8] sm:$0xff] }
   0xf   :  { %vm28_vm4 = vmor %vm27_vm2, %vm26_vm3  ;;  %s38_s12 = sshll.u32 %s94_s11, 4  ;;  %23 = vst [vmem:[#allocation5] sm:$0xff] %v21_v0  ;;  %s39_s12 = int_to_ptr.vmem [resolvable:$true] %s38_s12 }
  0x10   :  { %vm30_vm6 = vmor %vm29_vm5, %vm28_vm4  ;;  %s69_s13 = scalar_lea.vmem %s39_s12, 256  ;;  %p74_p6 = scmp.lt.s32.totalorder %s39_s12, %s39_s12 }
  0x11   :  { %31 = vst.msk [vmem:[#allocation5 + $0x8] sm:$0xff] %vm30_vm6, %v22_v1  ;;  %p70_p5 = scmp.ne.s32.totalorder %s39_s12, %s69_s13  ;;  %p75_p7 = scmp.lt.s32.totalorder %s69_s13, %s69_s13 }
  0x13   :  { %p76_p8 = por %p75_p7, %p74_p6 }
  0x15   :  { %p77_p9 = pnand %p76_p8, %p70_p5 }
  0x17   :  { %80 = shalt.err (!%p77_p9)
}
  0x18   :  { %41 = dma.vmem_to_hbm [thread:$0]  %s39_s12, 256, %s112_s1, [#allocation4]  }
  0x19   :  { %91 = dma.done.wait [#allocation4], 256  }
  0x1a   :  { %92 = vsyncadd [#allocation4], 4294967040 }
  0x1b   :  { %45 = vsyncpa [#allocation3], 1 }
  0x1c   :  { %46 = vsyncpa [#allocation4], 1 }

</bundles_post_ra>
